<compile_context>
chip_gen: v6e
topology: v6e:2x2x1
jax: 0.10.0
libtpu: 0.0.40
codegen_flags: <defaults>
</compile_context>

<pallas_src>
import jax
import jax.numpy as jnp
import numpy as np
from jax.experimental import pallas as pl
from jax.experimental.pallas import tpu as pltpu


LANE = 128
SUBLANE_BF16 = 16


def _round_up(n, m):
    return ((n + m - 1) // m) * m


def _cdiv(a, b):
    return -(-a // b)


# ------------------------------- kernel --------------------------------------


def _make_decoder_kernel(layer_specs):
    """layer_specs: list of dicts with keys: act (str|None), softplus (bool), fout (padded)."""
    n_layers = len(layer_specs)

    def kernel(x_ref, *refs):
        # refs = (w_0, ..., w_{L-1}, b_all, out)
        out_ref = refs[-1]
        b_all = refs[-2][...]                   # (L, F_max) f32, loaded once
        w_refs = refs[:n_layers]

        h = x_ref[...]                          # (tile_b, in_kern) bf16
        for l, spec in enumerate(layer_specs):
            fout = spec["fout"]
            w = w_refs[l][...]                  # (fin_p, fout_p) bf16
            b = b_all[l:l + 1, :fout]           # (1, fout_p) f32, broadcasts over rows
            lhs = h if h.dtype == jnp.bfloat16 else h.astype(jnp.bfloat16)
            # MXU matmul in bf16 with f32 accumulation; epilogue in f32.
            h = jnp.dot(lhs, w, preferred_element_type=jnp.float32) + b
            if spec["act"] == "relu":
                h = jnp.maximum(h, 0.0)
            elif spec["act"] == "tanh":
                h = jnp.tanh(h)
            elif spec["act"] == "leaky_relu":
                h = jnp.where(h >= 0.0, h, 0.01 * h)
            # Dropout (eval mode, p=0.0) == identity.
            if spec["softplus"]:
                # PyTorch Softplus(beta=1, threshold=20): x if x > 20 else log1p(exp(x))
                h = jnp.where(h > 20.0, h, jnp.log1p(jnp.exp(h)))
        out_ref[...] = h.astype(out_ref.dtype)

    return kernel


# ------------------------------- wrapper --------------------------------------


def _pick_tile_b(B, cap=1024):
    """Batch tile: minimal padding at 16-row (bf16 sublane) granularity, big tiles, >=2 steps
    for large B so both v7x TensorCores shard the parallel batch axis."""
    n_steps = max(1, _cdiv(B, cap))
    if B >= 1024:
        n_steps = max(n_steps, 2)
    tile = _round_up(_cdiv(B, n_steps), SUBLANE_BF16)
    if tile >= LANE:
        tile128 = _round_up(tile, LANE)        # full MXU LHS pushes, only if it adds no padding
        if _round_up(B, tile128) == _round_up(B, tile):
            tile = tile128
    return tile


def _const_spec(shape):
    """Single-buffered BlockSpec for grid-invariant operands (weights / packed bias)."""
    index_map = lambda i: (0,) * len(shape)
    try:
        return pl.BlockSpec(shape, index_map, pipeline_mode=pl.Buffered(1))
    except (TypeError, AttributeError):        # older JAX without pipeline_mode / Buffered
        return pl.BlockSpec(shape, index_map)


def gex_decoder_forward(x, weights, b_all, layer_specs, out_dim, *, slice_output=True):
    """x: (B, in_dim) f32/bf16.  weights: list of bf16 (fin_p, fout_p).  b_all: (L, F_max) f32."""
    B, in_dim = x.shape
    in_kern = weights[0].shape[0]              # round_up(in_dim, 16): no 128-lane pad on x
    out_pad = weights[-1].shape[1]

    tile_b = _pick_tile_b(B)
    B_pad = _round_up(B, tile_b)
    grid = (B_pad // tile_b,)

    # Cast x to bf16 once (MXU path is bf16 anyway); pad rows / tiny fin granule only if needed.
    x_bf16 = x.astype(jnp.bfloat16)
    if B_pad == B and in_kern == in_dim:
        x_p = x_bf16
    else:
        x_p = jnp.zeros((B_pad, in_kern), jnp.bfloat16).at[:B, :in_dim].set(x_bf16)

    x_spec = pl.BlockSpec((tile_b, in_kern), lambda i: (i, 0))
    w_specs = [_const_spec(w.shape) for w in weights]
    b_spec = _const_spec(b_all.shape)
    out_spec = pl.BlockSpec((tile_b, out_pad), lambda i: (i, 0))

    # Rough VMEM residency: single-buffered weights/bias + double-buffered x/out tiles + f32 h.
    f_max = int(b_all.shape[1])
    vmem_bytes = (sum(int(w.size) * 2 for w in weights) + int(b_all.size) * 4
                  + 2 * tile_b * in_kern * 2 + 2 * tile_b * out_pad * 4
                  + 2 * tile_b * f_max * 4)
    compiler_kwargs = dict(dimension_semantics=("parallel",))
    if vmem_bytes > 24 * 1024 * 1024:
        # v7x has 64 MiB physical / 32 MiB default-scoped VMEM; raise the limit only when the
        # whole-weight-resident design needs it.  For hidden dims where even this is not enough,
        # switch the large layers to a K/N-tiled matmul grid with an f32 accumulator scratch.
        compiler_kwargs["vmem_limit_bytes"] = min(int(vmem_bytes * 3 // 2), 112 * 1024 * 1024)

    flops = 2 * B_pad * sum(int(w.shape[0]) * int(w.shape[1]) for w in weights)
    bytes_accessed = (int(x_p.size) * 2 + sum(int(w.size) * 2 for w in weights)
                      + int(b_all.size) * 4 + B_pad * out_pad * 4)
    transcendentals = 2 * B_pad * out_pad if layer_specs[-1]["softplus"] else 0

    kernel = _make_decoder_kernel(layer_specs)
    out_p = pl.pallas_call(
        kernel,
        out_shape=jax.ShapeDtypeStruct((B_pad, out_pad), jnp.float32),
        grid_spec=pltpu.PrefetchScalarGridSpec(
            num_scalar_prefetch=0,
            grid=grid,
            in_specs=[x_spec] + w_specs + [b_spec],
            out_specs=out_spec,
        ),
        compiler_params=pltpu.CompilerParams(**compiler_kwargs),
        cost_estimate=pl.CostEstimate(
            flops=flops, transcendentals=transcendentals, bytes_accessed=bytes_accessed),
    )(x_p, *weights, b_all)

    if slice_output:
        # NOTE: extra HBM->HBM copy; prefer slice_output=False and let the consumer read the
        # lane-padded (B_pad, out_pad) buffer (padded lanes hold softplus(0)=log 2, never use them).
        return out_p[:B, :out_dim]
    return out_p


# -------------------------- parameter setup -----------------------------------


def init_raw_params(key, in_dim, num_layers, hidden_dims, out_dim,
                    batch_norm, activation, out_poisson):
    """PyTorch-Linear-like synthetic parameters (W stored as (fin, fout) == torch W.T)."""
    dims = [in_dim] + list(hidden_dims[:num_layers])
    keys = jax.random.split(key, num_layers + 1)
    layers = []
    for i in range(num_layers):
        fin, fout = dims[i], dims[i + 1]
        kw, kb, kg, kbt, km, kv = jax.random.split(keys[i], 6)
        bound = float(1.0 / np.sqrt(fin))
        W = jax.random.uniform(kw, (fin, fout), jnp.float32, -bound, bound)
        b = jax.random.uniform(kb, (fout,), jnp.float32, -bound, bound)
        bn = None
        if batch_norm:
            gamma = 1.0 + 0.05 * jax.random.normal(kg, (fout,), jnp.float32)
            beta = 0.05 * jax.random.normal(kbt, (fout,), jnp.float32)
            mu = 0.1 * jax.random.normal(km, (fout,), jnp.float32)
            var = jnp.abs(jax.random.normal(kv, (fout,), jnp.float32)) * 0.1 + 1.0
            bn = (gamma, beta, mu, var)
        layers.append({"W": W, "b": b, "bn": bn, "act": activation, "softplus": False})

    fin, fout = dims[num_layers], out_dim
    kw, kb = jax.random.split(keys[num_layers], 2)
    bound = float(1.0 / np.sqrt(fin))
    W = jax.random.uniform(kw, (fin, fout), jnp.float32, -bound, bound)
    b = jax.random.uniform(kb, (fout,), jnp.float32, -bound, bound)
    layers.append({"W": W, "b": b, "bn": None, "act": None, "softplus": out_poisson})
    return layers


def prepare_kernel_params(raw_layers, eps=1e-5):
    """Fold BN (inference) into Linear, pad features, cast weights to bf16.

    Layer-0 fin is padded only to the bf16 sublane granule (16) so x never needs a 128-lane pad
    pass in HBM; every other feature dim is padded to 128 lanes so all intermediates and the
    output store are full-lane (no masked vst.msk partial stores)."""
    weights, biases, specs = [], [], []
    for idx, lyr in enumerate(raw_layers):
        W, b = lyr["W"], lyr["b"]
        if lyr["bn"] is not None:
            gamma, beta, mu, var = lyr["bn"]
            scale = gamma * jax.lax.rsqrt(var + eps)
            W = W * scale[None, :]
            b = (b - mu) * scale + beta
        fin, fout = W.shape
        fin_p = _round_up(fin, SUBLANE_BF16) if idx == 0 else _round_up(fin, LANE)
        fout_p = _round_up(fout, LANE)
        Wp = jnp.zeros((fin_p, fout_p), jnp.float32).at[:fin, :fout].set(W)
        bp = jnp.zeros((fout_p,), jnp.float32).at[:fout].set(b)
        weights.append(Wp.astype(jnp.bfloat16))
        biases.append(bp)
        specs.append({"act": lyr["act"], "softplus": lyr["softplus"], "fout": fout_p})
    f_max = max(int(b.shape[0]) for b in biases)
    b_all = jnp.stack(
        [jnp.zeros((f_max,), jnp.float32).at[:b.shape[0]].set(b) for b in biases], axis=0)
    return weights, b_all, specs


# --------------------------- pure-JAX references -------------------------------


def _apply_act(h, act):
    if act == "relu":
        return jnp.maximum(h, 0.0)
    if act == "tanh":
        return jnp.tanh(h)
    if act == "leaky_relu":
        return jnp.where(h >= 0.0, h, 0.01 * h)
    return h


def reference_pytorch(x, raw_layers, eps=1e-5):
    """Original (unfolded, f32) PyTorch-semantics forward."""
    h = x.astype(jnp.float32)
    for lyr in raw_layers:
        h = h @ lyr["W"] + lyr["b"]
        if lyr["bn"] is not None:
            g, bt, mu, var = lyr["bn"]
            h = (h - mu) / jnp.sqrt(var + eps) * g + bt
        h = _apply_act(h, lyr["act"])
        if lyr["softplus"]:
            h = jnp.where(h > 20.0, h, jnp.log1p(jnp.exp(h)))
    return h


def reference_kernel_math(x, weights, b_all, specs, in_dim, out_dim):
    """Same folded / padded / bf16 math the kernel does, in plain JAX."""
    in_kern = weights[0].shape[0]
    h = jnp.zeros((x.shape[0], in_kern), jnp.bfloat16).at[:, :in_dim].set(
        x.astype(jnp.bfloat16))
    for l, spec in enumerate(specs):
        lhs = h if h.dtype == jnp.bfloat16 else h.astype(jnp.bfloat16)
        h = jnp.dot(lhs, weights[l],
                    preferred_element_type=jnp.float32) + b_all[l:l + 1, :spec["fout"]]
        h = _apply_act(h, spec["act"])
        if spec["softplus"]:
            h = jnp.where(h > 20.0, h, jnp.log1p(jnp.exp(h)))
    return h[:, :out_dim]


# ---------------------------------- main ---------------------------------------

if __name__ == "__main__":
    # GEXDecoder(in_dim=32, num_layers=2, hidden_dims=[64, 48], out_dim=96,
    #            out_poisson=True, batch_norm=True, activation='relu', dropout=0.0)
    IN_DIM, NUM_LAYERS, HIDDEN, OUT_DIM = 32, 2, [64, 48], 96
    BATCH = 16

    key = jax.random.PRNGKey(0)
    kx, kp = jax.random.split(key)
    x = jax.random.normal(kx, (BATCH, IN_DIM), jnp.float32)

    raw_layers = init_raw_params(
        kp, IN_DIM, NUM_LAYERS, HIDDEN, OUT_DIM,
        batch_norm=True, activation="relu", out_poisson=True,
    )
    weights, b_all, specs = prepare_kernel_params(raw_layers)

    # Skip the device-side output slice; slice on the host after transfer instead.
    out_padded = gex_decoder_forward(x, weights, b_all, specs, OUT_DIM, slice_output=False)
    out_padded = jax.block_until_ready(out_padded)
    out = np.asarray(out_padded)[:BATCH, :OUT_DIM]

    # Tight check: kernel vs identical folded/padded/bf16 math in plain JAX.
    ref_exact = np.asarray(reference_kernel_math(x, weights, b_all, specs, IN_DIM, OUT_DIM))
    np.testing.assert_allclose(out, ref_exact, rtol=5e-4, atol=5e-4)

    # Semantics check: kernel vs original f32 PyTorch-style forward
    # (bf16 x + bf16 weight quantization tolerance).
    ref_torch = np.asarray(reference_pytorch(x, raw_layers))
    np.testing.assert_allclose(out, ref_torch, rtol=3e-2, atol=3e-2)

    print("KERNEL_OK")
</pallas_src>

<mosaic_0001>
module attributes {stable_mosaic.version = 11 : i64} {
  func.func @kernel(%arg0: i32, %arg1: memref<16x32xbf16, #tpu.memory_space<vmem>>, %arg2: memref<32x128xbf16, #tpu.memory_space<vmem>>, %arg3: memref<128x128xbf16, #tpu.memory_space<vmem>>, %arg4: memref<128x128xbf16, #tpu.memory_space<vmem>>, %arg5: memref<3x128xf32, #tpu.memory_space<vmem>>, %arg6: memref<16x128xf32, #tpu.memory_space<vmem>>) attributes {dimension_semantics = [#tpu.dimension_semantics<parallel>], iteration_bounds = array<i64: 1>, scalar_prefetch = 0 : i64, scratch_operands = 0 : i64, tpu.core_type = #tpu.core_type<tc>, window_params = [{transform_indices = @transform_0, window_bounds = array<i64: 16, 32>}, {pipeline_mode = #tpu.pipeline_mode<synchronous>, transform_indices = @transform_1, window_bounds = array<i64: 32, 128>}, {pipeline_mode = #tpu.pipeline_mode<synchronous>, transform_indices = @transform_2, window_bounds = array<i64: 128, 128>}, {pipeline_mode = #tpu.pipeline_mode<synchronous>, transform_indices = @transform_3, window_bounds = array<i64: 128, 128>}, {pipeline_mode = #tpu.pipeline_mode<synchronous>, transform_indices = @transform_4, window_bounds = array<i64: 3, 128>}, {transform_indices = @transform_5, window_bounds = array<i64: 16, 128>}]} {
    %c0 = arith.constant 0 : index
    %c0_0 = arith.constant 0 : index
    %0 = vector.load %arg5[%c0, %c0_0] : memref<3x128xf32, #tpu.memory_space<vmem>>, vector<3x128xf32>
    %c0_1 = arith.constant 0 : index
    %c0_2 = arith.constant 0 : index
    %1 = vector.load %arg1[%c0_1, %c0_2] : memref<16x32xbf16, #tpu.memory_space<vmem>>, vector<16x32xbf16>
    %c0_3 = arith.constant 0 : index
    %c0_4 = arith.constant 0 : index
    %2 = vector.load %arg2[%c0_3, %c0_4] : memref<32x128xbf16, #tpu.memory_space<vmem>>, vector<32x128xbf16>
    %3 = vector.extract_strided_slice %0 {offsets = [0, 0], sizes = [1, 128], strides = [1, 1]} : vector<3x128xf32> to vector<1x128xf32>
    %cst = arith.constant dense<0.000000e+00> : vector<16x128xf32>
    %4 = tpu.matmul %1, %2, %cst {dimension_numbers = #tpu.dot_dimension_numbers<[1], [0], [0], [1], [0, 0, 1, 1], [], []>} : vector<16x32xbf16>, vector<32x128xbf16>, vector<16x128xf32> -> vector<16x128xf32>
    %5 = vector.broadcast %3 : vector<1x128xf32> to vector<16x128xf32>
    %6 = arith.addf %4, %5 : vector<16x128xf32>
    %cst_5 = arith.constant 0.000000e+00 : f32
    %7 = vector.broadcast %cst_5 : f32 to vector<16x128xf32>
    %8 = arith.maximumf %6, %7 : vector<16x128xf32>
    %c0_6 = arith.constant 0 : index
    %c0_7 = arith.constant 0 : index
    %9 = vector.load %arg3[%c0_6, %c0_7] : memref<128x128xbf16, #tpu.memory_space<vmem>>, vector<128x128xbf16>
    %10 = vector.extract_strided_slice %0 {offsets = [1, 0], sizes = [1, 128], strides = [1, 1]} : vector<3x128xf32> to vector<1x128xf32>
    %11 = arith.truncf %8 : vector<16x128xf32> to vector<16x128xbf16>
    %cst_8 = arith.constant dense<0.000000e+00> : vector<16x128xf32>
    %12 = tpu.matmul %11, %9, %cst_8 {dimension_numbers = #tpu.dot_dimension_numbers<[1], [0], [0], [1], [0, 0, 1, 1], [], []>} : vector<16x128xbf16>, vector<128x128xbf16>, vector<16x128xf32> -> vector<16x128xf32>
    %13 = vector.broadcast %10 : vector<1x128xf32> to vector<16x128xf32>
    %14 = arith.addf %12, %13 : vector<16x128xf32>
    %cst_9 = arith.constant 0.000000e+00 : f32
    %15 = vector.broadcast %cst_9 : f32 to vector<16x128xf32>
    %16 = arith.maximumf %14, %15 : vector<16x128xf32>
    %c0_10 = arith.constant 0 : index
    %c0_11 = arith.constant 0 : index
    %17 = vector.load %arg4[%c0_10, %c0_11] : memref<128x128xbf16, #tpu.memory_space<vmem>>, vector<128x128xbf16>
    %18 = vector.extract_strided_slice %0 {offsets = [2, 0], sizes = [1, 128], strides = [1, 1]} : vector<3x128xf32> to vector<1x128xf32>
    %19 = arith.truncf %16 : vector<16x128xf32> to vector<16x128xbf16>
    %cst_12 = arith.constant dense<0.000000e+00> : vector<16x128xf32>
    %20 = tpu.matmul %19, %17, %cst_12 {dimension_numbers = #tpu.dot_dimension_numbers<[1], [0], [0], [1], [0, 0, 1, 1], [], []>} : vector<16x128xbf16>, vector<128x128xbf16>, vector<16x128xf32> -> vector<16x128xf32>
    %21 = vector.broadcast %18 : vector<1x128xf32> to vector<16x128xf32>
    %22 = arith.addf %20, %21 : vector<16x128xf32>
    %cst_13 = arith.constant 2.000000e+01 : f32
    %23 = vector.broadcast %cst_13 : f32 to vector<16x128xf32>
    %24 = arith.cmpf ogt, %22, %23 : vector<16x128xf32>
    %25 = math.exp %22 : vector<16x128xf32>
    %26 = math.log1p %25 : vector<16x128xf32>
    %27 = arith.select %24, %22, %26 : vector<16x128xi1>, vector<16x128xf32>
    %c0_14 = arith.constant 0 : index
    %c0_15 = arith.constant 0 : index
    %28 = vector.load %arg6[%c0_14, %c0_15] : memref<16x128xf32, #tpu.memory_space<vmem>>, vector<16x128xf32>
    tpu.vector_store %arg6[%c0_14, %c0_15], %27 {strides = array<i32>} : memref<16x128xf32, #tpu.memory_space<vmem>>, vector<16x128xf32>,
    return
  }
  func.func @transform_0(%arg0: i32) -> (i32, i32) {
    %c0_i32 = arith.constant 0 : i32
    %c0_i32_0 = arith.constant 0 : i32
    return %arg0, %c0_i32 : i32, i32
  }
  func.func @transform_1(%arg0: i32) -> (i32, i32) {
    %c0_i32 = arith.constant 0 : i32
    %c0_i32_0 = arith.constant 0 : i32
    %c0_i32_1 = arith.constant 0 : i32
    return %c0_i32, %c0_i32_0 : i32, i32
  }
  func.func @transform_2(%arg0: i32) -> (i32, i32) {
    %c0_i32 = arith.constant 0 : i32
    %c0_i32_0 = arith.constant 0 : i32
    %c0_i32_1 = arith.constant 0 : i32
    return %c0_i32, %c0_i32_0 : i32, i32
  }
  func.func @transform_3(%arg0: i32) -> (i32, i32) {
    %c0_i32 = arith.constant 0 : i32
    %c0_i32_0 = arith.constant 0 : i32
    %c0_i32_1 = arith.constant 0 : i32
    return %c0_i32, %c0_i32_0 : i32, i32
  }
  func.func @transform_4(%arg0: i32) -> (i32, i32) {
    %c0_i32 = arith.constant 0 : i32
    %c0_i32_0 = arith.constant 0 : i32
    %c0_i32_1 = arith.constant 0 : i32
    return %c0_i32, %c0_i32_0 : i32, i32
  }
  func.func @transform_5(%arg0: i32) -> (i32, i32) {
    %c0_i32 = arith.constant 0 : i32
    %c0_i32_0 = arith.constant 0 : i32
    return %arg0, %c0_i32 : i32, i32
  }
}

</mosaic_0001>

<bundles_post_ra>
// kernel: tpu_custom_call.1
= control target key start
LH: loop header
LB: loop body
LE: loop exit
PB: predicated region body
PF: predicated region fallthrough
CT: control target
= control target key end

     0   :  { %10 = vsyncpa [#allocation3], 0  ;;  %s751_s0 = inlined_call_operand.hbm [shape: bf16[16,32], index: 0, kind: input, shape index: {}]   ;;  %s752_s1 = inlined_call_operand.hbm [shape: bf16[32,128], index: 1, kind: input, shape index: {}]   ;;  %s753_s2 = inlined_call_operand.hbm [shape: bf16[128,128], index: 2, kind: input, shape index: {}]   ;;  %s754_s3 = inlined_call_operand.hbm [shape: bf16[128,128], index: 3, kind: input, shape index: {}]   ;;  %s755_s4 = inlined_call_operand.vmem [shape: f32[3,128], index: 4, kind: input, shape index: {}]   ;;  %s756_s5 = inlined_call_operand.hbm [shape: f32[16,128], index: 5, kind: output, shape index: {}]  }
   0x1   :  { %11 = vsyncpa [#allocation6], 0 }
   0x2   :  { %12 = vsyncpa [#allocation9], 0 }
   0x3   :  { %13 = vsyncpa [#allocation4], 0  ;;  %s656_s18 = smov [#allocation5]   ;;  %s657_s20 = smov [#allocation2]  }
   0x4   :  { %s31_s19 = sshll.u32 %s656_s18, 4  ;;  %s19_s21 = sshll.u32 %s657_s20, 4  ;;  %s32_s19 = int_to_ptr.vmem [resolvable:$true] %s31_s19  ;;  %s20_s21 = int_to_ptr.vmem [resolvable:$true] %s19_s21 }
   0x5   :  { %s556_s22 = scalar_lea.vmem %s32_s19, 256  ;;  %p561_p1 = scmp.lt.s32.totalorder %s32_s19, %s32_s19 }
   0x6   :  { %p557_p0 = scmp.ne.s32.totalorder %s32_s19, %s556_s22  ;;  %p562_p2 = scmp.lt.s32.totalorder %s556_s22, %s556_s22 }
   0x8   :  { %p563_p3 = por %p562_p2, %p561_p1 }
   0xa   :  { %p564_p4 = pnand %p563_p3, %p557_p0 }
   0xc   :  { %567 = shalt.err (!%p564_p4)
}
   0xd   :  { %s658_s23 = smov 64   ;;  %s659_s24 = smov 4  }
   0xe   :  { %37 = dma.hbm_to_vmem [thread:$0]  %s752_s1, 256, %s32_s19, [#allocation6], %s658_s23, %s658_s23, %s659_s24  }
   0xf   :  { %s576_s27 = scalar_lea.vmem %s20_s21, 128  ;;  %p581_p6 = scmp.lt.s32.totalorder %s20_s21, %s20_s21 }
  0x10   :  { %p577_p5 = scmp.ne.s32.totalorder %s20_s21, %s576_s27  ;;  %p582_p7 = scmp.lt.s32.totalorder %s576_s27, %s576_s27 }
  0x12   :  { %p583_p8 = por %p582_p7, %p581_p6 }
  0x14   :  { %p584_p9 = pnand %p583_p8, %p577_p5 }
  0x16   :  { %587 = shalt.err (!%p584_p9)
}
  0x17   :  { %25 = dma.hbm_to_vmem [thread:$0]  %s751_s0, 128, %s20_s21, [#allocation3], %s658_s23, %s658_s23, %s659_s24  }
  0x18   :  { %s660_s30 = smov [#allocation7]   ;;  %s661_s7 = smov [#allocation8]  }
  0x19   :  { %s43_s6 = sshll.u32 %s660_s30, 4  ;;  %s55_s8 = sshll.u32 %s661_s7, 4  ;;  %s44_s6 = int_to_ptr.vmem [resolvable:$true] %s43_s6  ;;  %s56_s8 = int_to_ptr.vmem [resolvable:$true] %s55_s8 }
  0x1a   :  { %s596_s1 = scalar_lea.vmem %s44_s6, 1024  ;;  %p601_p11 = scmp.lt.s32.totalorder %s44_s6, %s44_s6 }
  0x1b   :  { %p597_p10 = scmp.ne.s32.totalorder %s44_s6, %s596_s1  ;;  %p602_p12 = scmp.lt.s32.totalorder %s596_s1, %s596_s1 }
  0x1d   :  { %p603_p13 = por %p602_p12, %p601_p11 }
  0x1f   :  { %p604_p0 = pnand %p603_p13, %p597_p10 }
  0x21   :  { %607 = shalt.err (!%p604_p0)
}
  0x22   :  { %49 = dma.hbm_to_vmem [thread:$0]  %s753_s2, 1024, %s44_s6, [#allocation6], %s658_s23, %s658_s23, %s659_s24  }
  0x23   :  { %s616_s0 = scalar_lea.vmem %s56_s8, 1024  ;;  %p621_p2 = scmp.lt.s32.totalorder %s56_s8, %s56_s8 }
  0x24   :  { %p617_p1 = scmp.ne.s32.totalorder %s56_s8, %s616_s0  ;;  %p622_p3 = scmp.lt.s32.totalorder %s616_s0, %s616_s0 }
  0x26   :  { %p623_p4 = por %p622_p3, %p621_p2 }
  0x28   :  { %p624_p5 = pnand %p623_p4, %p617_p1 }
  0x2a   :  { %627 = shalt.err (!%p624_p5)
}
  0x2b   :  { %61 = dma.hbm_to_vmem [thread:$0]  %s754_s3, 1024, %s56_s8, [#allocation9], %s658_s23, %s658_s23, %s659_s24  }
  0x2c   :  { %648 = dma.done.wait [#allocation3], 128  }
  0x2d   :  { %649 = vsyncadd [#allocation3], 4294967168 }
  0x2e   :  { %650 = dma.done.wait [#allocation6], 1280  }
  0x2f   :  { %651 = vsyncadd [#allocation6], 4294966016 }
  0x30   :  { %652 = dma.done.wait [#allocation9], 1024  }
  0x31   :  { %653 = vsyncadd [#allocation9], 4294966272  ;;  %v662_v0 = vmov 0.0   ;;  %vm663_vm0 = vmmov 0   ;;  %v521_v1 = vld [vmem:[#allocation5 + $0x8] sm:$0xff]   ;;  %v522_v2 = vld [vmem:[#allocation5] sm:$0xff]   ;;  %v84_v17 = vlaneseq }
  0x32   :  { %462 = vmatprep.subr.bf16.mxu0 %v662_v0  ;;  %466 = vmatprep.mubr.msk.bf16.mxu0 %vm663_vm0, %v662_v0  ;;  %v524_v3 = vld [vmem:[#allocation7 + $0x38] sm:$0xff]   ;;  %v523_v4 = vld [vmem:[#allocation2] sm:$0xff]   ;;  %v525_v5 = vld [vmem:[#allocation7 + $0x30] sm:$0xff]   ;;  %vm105_vm1 = vcmask 261120  }
  0x33   :  { %470 = vmatprep.subr.bf16.mxu1 %v662_v0  ;;  %486 = vmatprep.mubr.msk.bf16.mxu1 %vm663_vm0, %v662_v0  ;;  %v526_v6 = vld [vmem:[#allocation7 + $0x28] sm:$0xff]   ;;  %v527_v7 = vld [vmem:[#allocation7 + $0x20] sm:$0xff]   ;;  %v528_v8 = vld [vmem:[#allocation7 + $0x18] sm:$0xff]   ;;  %v85_v18 = vshrl.u32 %v84_v17, 7 }
  0x34   :  { %463 = vmatpush3.bf16.msra.mxu0 %v521_v1  ;;  %471 = vmatpush3.bf16.msra.mxu1 %v524_v3  ;;  %v529_v9 = vld [vmem:[#allocation7 + $0x10] sm:$0xff]   ;;  %v530_v10 = vld [vmem:[#allocation7 + $0x8] sm:$0xff]   ;;  %v531_v11 = vld [vmem:[#allocation7] sm:$0xff]  }
  0x35   :  { %464 = vmatprep.subr.bf16.mxu0 %v662_v0  ;;  %472 = vmatprep.subr.bf16.mxu1 %v662_v0  ;;  %v532_v12 = vld [vmem:[#allocation8 + $0x38] sm:$0xff]   ;;  %v533_v13 = vld [vmem:[#allocation8 + $0x30] sm:$0xff]   ;;  %v534_v14 = vld [vmem:[#allocation8 + $0x28] sm:$0xff]   ;;  %v86_v19 = vsub.s32 0, %v85_v18  ;;  %v171_v34 = vsub.s32 1, %v85_v18  ;;  %v283_v45 = vsub.s32 2, %v85_v18 }
  0x36   :  { %v535_v15 = vld [vmem:[#allocation8 + $0x20] sm:$0xff]   ;;  %v536_v16 = vld [vmem:[#allocation8 + $0x18] sm:$0xff]   ;;  %v77_v20 = vld [vmem:[%s755_s4] sm:$0x7]  ;;  %s664_s4 = smov [#allocation10]  }
  0x37   :  { %v87_v21 = vrot.slane %v77_v20, %v86_v19  ;;  %v537_v31 = vld [vmem:[#allocation8 + $0x10] sm:$0xff]   ;;  %v538_v32 = vld [vmem:[#allocation8 + $0x8] sm:$0xff]   ;;  %v539_v33 = vld [vmem:[#allocation8] sm:$0xff]   ;;  %v172_v35 = vrot.slane %v77_v20, %v171_v34  ;;  %v284_v46 = vrot.slane %v77_v20, %v283_v45  ;;  %s407_s13 = sshll.u32 %s664_s4, 4  ;;  %s408_s13 = int_to_ptr.vmem [resolvable:$true] %s407_s13 }
  0x38   :  { %465 = vmatpush3.bf16.msra.mxu0 %v522_v2  ;;  %473 = vmatpush3.bf16.msra.mxu1 %v525_v5  ;;  %s628_s14 = scalar_lea.vmem %s408_s13, 256  ;;  %p633_p7 = scmp.lt.s32.totalorder %s408_s13, %s408_s13 }
  0x39   :  { %490 = vmatprep.subr.bf16.mxu0 %v662_v0  ;;  %474 = vmatprep.subr.bf16.mxu1 %v662_v0  ;;  %p629_p6 = scmp.ne.s32.totalorder %s408_s13, %s628_s14  ;;  %p634_p8 = scmp.lt.s32.totalorder %s628_s14, %s628_s14 }
  0x3b   :  { %467 = vmatmul.mubr.msk.bf16.vlgmr.msra.gmra.mxu0 %vm105_vm1, %v523_v4  ;;  %p635_p9 = por %p634_p8, %p633_p7 }
  0x3c   :  { %506 = vmatprep.mubr.msk.bf16.mxu0 %vm663_vm0, %v662_v0  ;;  %475 = vmatpush3.bf16.msra.mxu1 %v526_v6 }
  0x3d   :  { %476 = vmatprep.subr.bf16.mxu1 %v662_v0  ;;  %491 = vmatpush3.bf16.msra.mxu0 %v532_v12  ;;  %p636_p10 = pnand %p635_p9, %p629_p6 }
  0x3e   :  { %492 = vmatprep.subr.bf16.mxu0 %v662_v0 }
  0x40   :  { %477 = vmatpush3.bf16.msra.mxu1 %v527_v7 }
  0x41   :  { %478 = vmatprep.subr.bf16.mxu1 %v662_v0  ;;  %493 = vmatpush3.bf16.msra.mxu0 %v533_v13 }
  0x42   :  { %494 = vmatprep.subr.bf16.mxu0 %v662_v0 }
  0x44   :  { %479 = vmatpush3.bf16.msra.mxu1 %v528_v8 }
  0x45   :  { %480 = vmatprep.subr.bf16.mxu1 %v662_v0  ;;  %495 = vmatpush3.bf16.msra.mxu0 %v534_v14 }
  0x46   :  { %496 = vmatprep.subr.bf16.mxu0 %v662_v0 }
  0x48   :  { %481 = vmatpush3.bf16.msra.mxu1 %v529_v9 }
  0x49   :  { %482 = vmatprep.subr.bf16.mxu1 %v662_v0  ;;  %497 = vmatpush3.bf16.msra.mxu0 %v535_v15 }
  0x4a   :  { %498 = vmatprep.subr.bf16.mxu0 %v662_v0 }
  0x4c   :  { %483 = vmatpush3.bf16.msra.mxu1 %v530_v10 }
  0x4d   :  { %484 = vmatprep.subr.bf16.mxu1 %v662_v0  ;;  %499 = vmatpush3.bf16.msra.mxu0 %v536_v16 }
  0x4e   :  { %500 = vmatprep.subr.bf16.mxu0 %v662_v0 }
  0x50   :  { %485 = vmatpush3.bf16.msra.mxu1 %v531_v11 }
  0x51   :  { %501 = vmatpush3.bf16.msra.mxu0 %v537_v31 }
  0x52   :  { %502 = vmatprep.subr.bf16.mxu0 %v662_v0 }
  0x55   :  { %503 = vmatpush3.bf16.msra.mxu0 %v538_v32 }
  0x56   :  { %504 = vmatprep.subr.bf16.mxu0 %v662_v0 }
  0x59   :  { %505 = vmatpush3.bf16.msra.mxu0 %v539_v33 }
  0xfb   :  { %v143_v22 = vpop.f32.mrf.mxu0 }
  0xfc   :  { %v144_v24 = vadd.f32 %v143_v22, %v87_v21 }
  0xfd   :  { %v468_v23 = vpop.f32.mrf.mxu0 }
  0xfe   :  { %v150_v28 = vmax.f32 %v144_v24, 0.0 }
  0xff   :  { %v146_v25 = vpop.f32.mrf.mxu0 }
 0x100   :  { %v147_v26 = vadd.f32 %v146_v25, %v87_v21 }
 0x101   :  { %v469_v27 = vpop.f32.mrf.mxu0 }
 0x102   :  { %v151_v29 = vmax.f32 %v147_v26, 0.0 }
 0x104   :  { %v168_v30 = vpack.c.bf16 %v151_v29, %v150_v28 }
 0x106   :  { %487 = vmatmul.mubr.bf16.vlgmr.msra.gmra.mxu1 %v168_v30 }
 0x1c6   :  { %v255_v36 = vpop.f32.mrf.mxu1 }
 0x1c7   :  { %v256_v38 = vadd.f32 %v255_v36, %v172_v35 }
 0x1c8   :  { %v488_v37 = vpop.f32.mrf.mxu1 }
 0x1c9   :  { %v262_v42 = vmax.f32 %v256_v38, 0.0 }
 0x1ca   :  { %v258_v39 = vpop.f32.mrf.mxu1 }
 0x1cb   :  { %v259_v40 = vadd.f32 %v258_v39, %v172_v35 }
 0x1cc   :  { %v489_v41 = vpop.f32.mrf.mxu1 }
 0x1cd   :  { %v263_v43 = vmax.f32 %v259_v40, 0.0 }
 0x1cf   :  { %v280_v44 = vpack.c.bf16 %v263_v43, %v262_v42 }
 0x1d1   :  { %507 = vmatmul.mubr.bf16.vlgmr.msra.gmra.mxu0 %v280_v44 }
 0x291   :  { %v367_v47 = vpop.f32.mrf.mxu0 }
 0x292   :  { %v368_v48 = vadd.f32 %v367_v47, %v284_v46 }
 0x293   :  { %v508_v49 = vpop.f32.mrf.mxu0 }
 0x294   :  { %v376_v50 = vmul.f32 1.442695, %v368_v48  ;;  %vm374_vm3 = vcmp.gt.f32.partialorder %v368_v48, 20.0 }
 0x295   :  { %v370_v51 = vpop.f32.mrf.mxu0 }
 0x296   :  { %540 = vpow2.f32 %v376_v50  ;;  %v371_v52 = vadd.f32 %v370_v51, %v284_v46 }
 0x297   :  { %v509_v53 = vpop.f32.mrf.mxu0 }
 0x298   :  { %v378_v54 = vmul.f32 1.442695, %v371_v52  ;;  %vm375_vm5 = vcmp.gt.f32.partialorder %v371_v52, 20.0 }
 0x29a   :  { %542 = vpow2.f32 %v378_v54 }
 0x2a3   :  { %v541_v55 = vpop.eup %540 }
 0x2a4   :  { %v380_v56 = vadd.f32 1.0, %v541_v55  ;;  %v383_v59 = vmul.f32 -0.5, %v541_v55  ;;  %v386_v62 = vand.u32 2147483647, %v541_v55 }
 0x2a6   :  { %544 = vlog2.f32 %v380_v56  ;;  %v384_v60 = vadd.f32 1.0, %v383_v59  ;;  %vm387_vm2 = vcmp.lt.f32.partialorder %v386_v62, 0.0004427343 }
 0x2a7   :  { %v543_v57 = vpop.eup %542 }
 0x2a8   :  { %v389_v58 = vadd.f32 1.0, %v543_v57  ;;  %v392_v61 = vmul.f32 -0.5, %v543_v57  ;;  %v385_v1 = vmul.f32 %v541_v55, %v384_v60  ;;  %v395_v3 = vand.u32 2147483647, %v543_v57 }
 0x2aa   :  { %546 = vlog2.f32 %v389_v58  ;;  %v393_v2 = vadd.f32 1.0, %v392_v61  ;;  %vm396_vm4 = vcmp.lt.f32.partialorder %v395_v3, 0.0004427343 }
 0x2ac   :  { %v394_v8 = vmul.f32 %v543_v57, %v393_v2 }
 0x2b3   :  { %v545_v63 = vpop.eup %544 }
 0x2b4   :  { %v382_v0 = vmul.f32 0.6931472, %v545_v63 }
 0x2b6   :  { %v388_v4 = vsel %vm387_vm2, %v385_v1, %v382_v0 }
 0x2b7   :  { %v547_v5 = vpop.eup %546  ;;  %v398_v6 = vsel %vm374_vm3, %v368_v48, %v388_v4 }
 0x2b8   :  { %400 = vst [vmem:[#allocation10] sm:$0xff] %v398_v6  ;;  %v391_v7 = vmul.f32 0.6931472, %v547_v5 }
 0x2ba   :  { %v397_v9 = vsel %vm396_vm4, %v394_v8, %v391_v7 }
 0x2bb   :  { %v399_v10 = vsel %vm375_vm5, %v371_v52, %v397_v9 }
 0x2bc   :  { %401 = vst [vmem:[#allocation10 + $0x8] sm:$0xff] %v399_v10 }
 0x2bd   :  { %639 = shalt.err (!%p636_p10)
}
 0x2be   :  { %s665_s15 = smov 128   ;;  %s666_s16 = smov 8  }
 0x2bf   :  { %413 = dma.vmem_to_hbm [thread:$0]  %s408_s13, 256, %s756_s5, [#allocation4], %s665_s15, %s665_s15, %s666_s16  }
 0x2c0   :  { %654 = dma.done.wait [#allocation4], 256  }
 0x2c1   :  { %655 = vsyncadd [#allocation4], 4294967040 }
 0x2c2   :  { %417 = vsyncpa [#allocation3], 1 }
 0x2c3   :  { %418 = vsyncpa [#allocation6], 1 }
 0x2c4   :  { %419 = vsyncpa [#allocation9], 1 }
 0x2c5   :  { %420 = vsyncpa [#allocation4], 1 }

</bundles_post_ra>
